<compile_context>
chip_gen: v5e
topology: v5e:2x2
jax: 0.10.0
libtpu: 0.0.40
codegen_flags: <defaults>
</compile_context>

<pallas_src>
import functools

import jax
import jax.numpy as jnp
from jax.experimental import pallas as pl
from jax.experimental.pallas import tpu as pltpu

LANES = 128
SUBLANES = 8
TARGET_BLOCK_BYTES = 4 << 20       # ~4 MiB per input block (dtype-aware rows)


def _num_partials():
    """2 partials only where a device has 2 TensorCores sharing HBM (v7x)."""
    try:
        kind = jax.devices()[0].device_kind.lower()
    except Exception:
        return 1
    if "v7" in kind:
        return 2
    return 1


def _bce_partial_kernel(x_ref, t_ref, out_ref, *, tile_rows, rows, tiles_per_core):
    c = pl.program_id(0)   # partial / core index
    i = pl.program_id(1)   # tile index within this partial

    @pl.when(i == 0)
    def _():
        out_ref[...] = jnp.zeros_like(out_ref)

    x = x_ref[...].astype(jnp.float32)
    t = t_ref[...].astype(jnp.float32)

    # Numerically stable BCE-with-logits: max(x,0) - x*t + log1p(exp(-|x|))
    loss = jnp.maximum(x, 0.0) - x * t + jnp.log1p(jnp.exp(-jnp.abs(x)))

    # Rows of this tile that actually exist in the (rows, 128) input.  `rows`
    # counts 128-lane rows (not elements), so int32 is plenty.
    tile_idx = c * tiles_per_core + i
    valid_rows = rows - tile_idx * tile_rows

    @pl.when(valid_rows >= tile_rows)          # steady state: no masking at all
    def _():
        out_ref[...] += loss.reshape(tile_rows // SUBLANES, SUBLANES, LANES).sum(axis=0)

    @pl.when(valid_rows < tile_rows)           # ragged last tile / duplicated tile
    def _():
        row = jax.lax.broadcasted_iota(jnp.int32, (tile_rows, 1), 0)
        masked = jnp.where(row < valid_rows, loss, 0.0)
        out_ref[...] += masked.reshape(tile_rows // SUBLANES, SUBLANES, LANES).sum(axis=0)


def _stable_bce_sum(x, t):
    x = x.astype(jnp.float32)
    t = t.astype(jnp.float32)
    return jnp.sum(jnp.maximum(x, 0.0) - x * t + jnp.log1p(jnp.exp(-jnp.abs(x))),
                   dtype=jnp.float32)


def bce_with_logits_loss(outs, targets):
    """Equivalent of nn.BCEWithLogitsLoss (mean reduction) over all elements."""
    # .squeeze() only changes shape; since we flatten, it does not affect the
    # mean.  Cast to f32 happens inside the kernel (stream original dtype).
    x_flat = jnp.ravel(outs)
    t_flat = jnp.ravel(targets)
    n = x_flat.shape[0]
    if n == 0:
        # torch's BCEWithLogitsLoss(mean) over an empty tensor is NaN.
        return jnp.float32(float("nan"))

    quantum = SUBLANES * LANES                     # 1024: keeps rows 8-aligned
    n_main = (n // quantum) * quantum              # kernel handles this prefix
    tail = n - n_main                              # <1024 elems: plain-JAX sum

    total = jnp.float32(0.0)

    if n_main:
        rows = n_main // LANES                     # multiple of 8 by construction
        x = x_flat[:n_main].reshape(rows, LANES)   # free reshape (no pad copy)
        t = t_flat[:n_main].reshape(rows, LANES)

        # dtype-aware tile size: ~TARGET_BLOCK_BYTES per input block.
        max_itemsize = max(x.dtype.itemsize, t.dtype.itemsize)
        tile_rows = (TARGET_BLOCK_BYTES // (LANES * max_itemsize)) // SUBLANES * SUBLANES
        tile_rows = max(SUBLANES, min(tile_rows, rows))

        num_tiles = pl.cdiv(rows, tile_rows)
        num_partials = min(_num_partials(), num_tiles)
        tiles_per_core = pl.cdiv(num_tiles, num_partials)
        last_tile = num_tiles - 1

        def in_map(c, i):
            # Clamp so duplicated / overhanging tail grid points DMA an
            # in-bounds tile; the kernel masks their contribution via valid_rows.
            return (jnp.minimum(c * tiles_per_core + i, last_tile), 0)

        kernel = functools.partial(
            _bce_partial_kernel,
            tile_rows=tile_rows, rows=rows, tiles_per_core=tiles_per_core)

        x_block_bytes = tile_rows * LANES * x.dtype.itemsize
        t_block_bytes = tile_rows * LANES * t.dtype.itemsize
        # 2 double-buffered input streams + generous slack; explicit so the
        # bigger blocks also fit under v5e's 16 MiB scoped-VMEM default.
        vmem_limit = int(2 * (x_block_bytes + t_block_bytes) + (8 << 20))

        partials = pl.pallas_call(
            kernel,
            out_shape=jax.ShapeDtypeStruct((num_partials * SUBLANES, LANES), jnp.float32),
            grid_spec=pltpu.PrefetchScalarGridSpec(
                num_scalar_prefetch=0,
                grid=(num_partials, tiles_per_core),
                in_specs=[
                    pl.BlockSpec((tile_rows, LANES), in_map),
                    pl.BlockSpec((tile_rows, LANES), in_map),
                ],
                out_specs=pl.BlockSpec((SUBLANES, LANES), lambda c, i: (c, 0)),
            ),
            compiler_params=pltpu.CompilerParams(
                dimension_semantics=("parallel", "arbitrary"),
                vmem_limit_bytes=vmem_limit),
            cost_estimate=pl.CostEstimate(
                flops=6 * n_main,
                transcendentals=2 * n_main,
                bytes_accessed=n_main * (x.dtype.itemsize + t.dtype.itemsize)
                + num_partials * SUBLANES * LANES * 4),
        )(x, t)
        total = total + jnp.sum(partials, dtype=jnp.float32)

    if tail:
        # <1024 leftover elements: negligible HBM traffic, plain JAX.
        total = total + _stable_bce_sum(x_flat[n_main:], t_flat[n_main:])

    return total / jnp.float32(n)


def _reference(logits, targets):
    x = logits.astype(jnp.float32)
    t = targets.astype(jnp.float32)
    return jnp.mean(jnp.maximum(x, 0.0) - x * t + jnp.log1p(jnp.exp(-jnp.abs(x))))


if __name__ == "__main__":
    key = jax.random.PRNGKey(0)
    k1, k2, k3, k4, k5, k6 = jax.random.split(key, 6)

    # Segmentation-style logits/targets pair (small, 1024-aligned shape).
    shape = (2, 4, 16, 16)
    logits = jax.random.normal(k1, shape, dtype=jnp.float32) * 2.0
    targets = (jax.random.uniform(k2, shape) > 0.5).astype(jnp.float32)
    loss = jax.block_until_ready(bce_with_logits_loss(logits, targets))
    ref = _reference(logits, targets)
    assert jnp.allclose(loss, ref, rtol=1e-5, atol=1e-5), (loss, ref)

    # Tiny ragged shape: exercises the pure plain-JAX tail path (n < 1024).
    shape2 = (3, 5, 7)
    logits2 = jax.random.normal(k3, shape2, dtype=jnp.float32) * 2.0
    targets2 = (jax.random.uniform(k4, shape2) > 0.5).astype(jnp.float32)
    loss2 = jax.block_until_ready(bce_with_logits_loss(logits2, targets2))
    ref2 = _reference(logits2, targets2)
    assert jnp.allclose(loss2, ref2, rtol=1e-5, atol=1e-5), (loss2, ref2)

    # Unaligned larger shape: exercises kernel prefix + plain-JAX remainder.
    shape3 = (2, 3, 33, 37)
    logits3 = jax.random.normal(k5, shape3, dtype=jnp.float32) * 2.0
    targets3 = (jax.random.uniform(k6, shape3) > 0.5).astype(jnp.float32)
    loss3 = jax.block_until_ready(bce_with_logits_loss(logits3, targets3))
    ref3 = _reference(logits3, targets3)
    assert jnp.allclose(loss3, ref3, rtol=1e-5, atol=1e-5), (loss3, ref3)

    print("KERNEL_OK")
</pallas_src>

<mosaic_0001>
module attributes {stable_mosaic.version = 11 : i64} {
  func.func @_bce_partial_kernel(%arg0: i32, %arg1: i32, %arg2: memref<16x128xf32, #tpu.memory_space<vmem>>, %arg3: memref<16x128xf32, #tpu.memory_space<vmem>>, %arg4: memref<8x128xf32, #tpu.memory_space<vmem>>) attributes {dimension_semantics = [#tpu.dimension_semantics<parallel>, #tpu.dimension_semantics<arbitrary>], iteration_bounds = array<i64: 1, 1>, scalar_prefetch = 0 : i64, scratch_operands = 0 : i64, tpu.core_type = #tpu.core_type<tc>, window_params = [{transform_indices = @transform_0, window_bounds = array<i64: 16, 128>}, {transform_indices = @transform_1, window_bounds = array<i64: 16, 128>}, {transform_indices = @transform_2, window_bounds = array<i64: 8, 128>}]} {
    %c0_i32 = arith.constant 0 : i32
    %0 = arith.cmpi eq, %arg1, %c0_i32 : i32
    %1 = arith.extui %0 : i1 to i32
    %c0_i32_0 = arith.constant 0 : i32
    %2 = arith.cmpi ne, %1, %c0_i32_0 : i32
    scf.if %2 {
      %cst_10 = arith.constant 0.000000e+00 : f32
      %25 = vector.broadcast %cst_10 : f32 to vector<8x128xf32>
      %c0_11 = arith.constant 0 : index
      %c0_12 = arith.constant 0 : index
      %26 = vector.load %arg4[%c0_11, %c0_12] : memref<8x128xf32, #tpu.memory_space<vmem>>, vector<8x128xf32>
      tpu.vector_store %arg4[%c0_11, %c0_12], %25 {strides = array<i32>} : memref<8x128xf32, #tpu.memory_space<vmem>>, vector<8x128xf32>,
    } else {
    }
    %c0 = arith.constant 0 : index
    %c0_1 = arith.constant 0 : index
    %3 = vector.load %arg2[%c0, %c0_1] : memref<16x128xf32, #tpu.memory_space<vmem>>, vector<16x128xf32>
    %c0_2 = arith.constant 0 : index
    %c0_3 = arith.constant 0 : index
    %4 = vector.load %arg3[%c0_2, %c0_3] : memref<16x128xf32, #tpu.memory_space<vmem>>, vector<16x128xf32>
    %cst = arith.constant 0.000000e+00 : f32
    %5 = vector.broadcast %cst : f32 to vector<16x128xf32>
    %6 = arith.maximumf %3, %5 : vector<16x128xf32>
    %7 = arith.mulf %3, %4 : vector<16x128xf32>
    %8 = arith.subf %6, %7 : vector<16x128xf32>
    %9 = math.absf %3 : vector<16x128xf32>
    %cst_4 = arith.constant 0.000000e+00 : f32
    %10 = vector.broadcast %cst_4 : f32 to vector<16x128xf32>
    %11 = arith.subf %10, %9 : vector<16x128xf32>
    %12 = math.exp %11 : vector<16x128xf32>
    %13 = math.log1p %12 : vector<16x128xf32>
    %14 = arith.addf %8, %13 : vector<16x128xf32>
    %c1_i32 = arith.constant 1 : i32
    %15 = arith.muli %arg0, %c1_i32 : i32
    %16 = arith.addi %15, %arg1 : i32
    %c16_i32 = arith.constant 16 : i32
    %17 = arith.muli %16, %c16_i32 : i32
    %c16_i32_5 = arith.constant 16 : i32
    %18 = arith.subi %c16_i32_5, %17 : i32
    %c16_i32_6 = arith.constant 16 : i32
    %19 = arith.cmpi sge, %18, %c16_i32_6 : i32
    %20 = arith.extui %19 : i1 to i32
    %c0_i32_7 = arith.constant 0 : i32
    %21 = arith.cmpi ne, %20, %c0_i32_7 : i32
    scf.if %21 {
      %c0_10 = arith.constant 0 : index
      %c0_11 = arith.constant 0 : index
      %25 = vector.load %arg4[%c0_10, %c0_11] : memref<8x128xf32, #tpu.memory_space<vmem>>, vector<8x128xf32>
      %26 = vector.shape_cast %14 : vector<16x128xf32> to vector<2x8x128xf32>
      %cst_12 = arith.constant dense<0.000000e+00> : vector<8x128xf32>
      %27 = vector.multi_reduction <add>, %26, %cst_12 [0] : vector<2x8x128xf32> to vector<8x128xf32>
      %28 = arith.addf %25, %27 : vector<8x128xf32>
      %c0_13 = arith.constant 0 : index
      %c0_14 = arith.constant 0 : index
      %29 = vector.load %arg4[%c0_13, %c0_14] : memref<8x128xf32, #tpu.memory_space<vmem>>, vector<8x128xf32>
      tpu.vector_store %arg4[%c0_13, %c0_14], %28 {strides = array<i32>} : memref<8x128xf32, #tpu.memory_space<vmem>>, vector<8x128xf32>,
    } else {
    }
    %c16_i32_8 = arith.constant 16 : i32
    %22 = arith.cmpi slt, %18, %c16_i32_8 : i32
    %23 = arith.extui %22 : i1 to i32
    %c0_i32_9 = arith.constant 0 : i32
    %24 = arith.cmpi ne, %23, %c0_i32_9 : i32
    scf.if %24 {
      %25 = tpu.iota {dimensions = array<i32: 0>} : vector<16x1xi32>
      %26 = vector.broadcast %18 : i32 to vector<16x1xi32>
      %27 = arith.cmpi slt, %25, %26 : vector<16x1xi32>
      %cst_10 = arith.constant 0.000000e+00 : f32
      %28 = vector.shape_cast %27 : vector<16x1xi1> to vector<16x1xi1>
      %29 = vector.broadcast %28 : vector<16x1xi1> to vector<16x128xi1>
      %30 = vector.broadcast %cst_10 : f32 to vector<16x128xf32>
      %31 = arith.select %29, %14, %30 : vector<16x128xi1>, vector<16x128xf32>
      %c0_11 = arith.constant 0 : index
      %c0_12 = arith.constant 0 : index
      %32 = vector.load %arg4[%c0_11, %c0_12] : memref<8x128xf32, #tpu.memory_space<vmem>>, vector<8x128xf32>
      %33 = vector.shape_cast %31 : vector<16x128xf32> to vector<2x8x128xf32>
      %cst_13 = arith.constant dense<0.000000e+00> : vector<8x128xf32>
      %34 = vector.multi_reduction <add>, %33, %cst_13 [0] : vector<2x8x128xf32> to vector<8x128xf32>
      %35 = arith.addf %32, %34 : vector<8x128xf32>
      %c0_14 = arith.constant 0 : index
      %c0_15 = arith.constant 0 : index
      %36 = vector.load %arg4[%c0_14, %c0_15] : memref<8x128xf32, #tpu.memory_space<vmem>>, vector<8x128xf32>
      tpu.vector_store %arg4[%c0_14, %c0_15], %35 {strides = array<i32>} : memref<8x128xf32, #tpu.memory_space<vmem>>, vector<8x128xf32>,
    } else {
    }
    return
  }
  func.func @transform_0(%arg0: i32, %arg1: i32) -> (i32, i32) {
    %c1_i32 = arith.constant 1 : i32
    %0 = arith.muli %arg0, %c1_i32 : i32
    %1 = arith.addi %0, %arg1 : i32
    %c0_i32 = arith.constant 0 : i32
    %2 = arith.minsi %1, %c0_i32 : i32
    %c0_i32_0 = arith.constant 0 : i32
    %c0_i32_1 = arith.constant 0 : i32
    return %2, %c0_i32_0 : i32, i32
  }
  func.func @transform_1(%arg0: i32, %arg1: i32) -> (i32, i32) {
    %c1_i32 = arith.constant 1 : i32
    %0 = arith.muli %arg0, %c1_i32 : i32
    %1 = arith.addi %0, %arg1 : i32
    %c0_i32 = arith.constant 0 : i32
    %2 = arith.minsi %1, %c0_i32 : i32
    %c0_i32_0 = arith.constant 0 : i32
    %c0_i32_1 = arith.constant 0 : i32
    return %2, %c0_i32_0 : i32, i32
  }
  func.func @transform_2(%arg0: i32, %arg1: i32) -> (i32, i32) {
    %c0_i32 = arith.constant 0 : i32
    %c0_i32_0 = arith.constant 0 : i32
    return %arg0, %c0_i32 : i32, i32
  }
}

</mosaic_0001>

<bundles_post_ra>
// kernel: tpu_custom_call.1
= control target key start
LH: loop header
LB: loop body
LE: loop exit
PB: predicated region body
PF: predicated region fallthrough
CT: control target
= control target key end

     0   :  { %7 = vsyncpa [#allocation3], 0  ;;  %s281_s0 = inlined_call_operand.hbm [shape: f32[16,128], index: 0, kind: input, shape index: {}]   ;;  %s282_s1 = inlined_call_operand.hbm [shape: f32[16,128], index: 1, kind: input, shape index: {}]   ;;  %s283_s2 = inlined_call_operand.hbm [shape: f32[8,128], index: 2, kind: output, shape index: {}]  }
   0x1   :  { %8 = vsyncpa [#allocation6], 0 }
   0x2   :  { %9 = vsyncpa [#allocation4], 0  ;;  %s20_s11 = sshll.u32 %s281_s0, 4  ;;  %s252_s12 = smov [#allocation2]   ;;  %s21_s11 = int_to_ptr.hbm [resolvable:$true] %s20_s11 }
   0x3   :  { %s22_s13 = sshll.u32 %s252_s12, 4  ;;  %s39_s16 = sshll.u32 %s282_s1, 4  ;;  %s23_s13 = int_to_ptr.vmem [resolvable:$true] %s22_s13  ;;  %s40_s16 = int_to_ptr.hbm [resolvable:$true] %s39_s16 }
   0x4   :  { %s253_s17 = smov 128   ;;  %s254_s18 = smov 8  }
   0x5   :  { %28 = dma.hbm_to_vmem [thread:$0]  %s21_s11, 256, %s23_s13, [#allocation3], %s253_s17, %s253_s17, %s254_s18  }
   0x6   :  { %s255_s19 = smov [#allocation5]  }
   0x7   :  { %s41_s20 = sshll.u32 %s255_s19, 4  ;;  %s42_s20 = int_to_ptr.vmem [resolvable:$true] %s41_s20 }
   0x8   :  { %47 = dma.hbm_to_vmem [thread:$0]  %s40_s16, 256, %s42_s20, [#allocation6], %s253_s17, %s253_s17, %s254_s18  }
   0x9   :  { %246 = dma.done.wait [#allocation3], 256  }
   0xa   :  { %247 = vsyncadd [#allocation3], 4294967040 }
   0xb   :  { %248 = dma.done.wait [#allocation6], 256  }
   0xc   :  { %249 = vsyncadd [#allocation6], 4294967040  ;;  %v69_v0 = vld [vmem:[#allocation2] sm:$0xff]  ;;  %v70_v1 = vld [vmem:[#allocation2 + $0x8] sm:$0xff]  ;;  %s256_s0 = smov [#allocation7]   ;;  %s145_s23 = sshll.u32 %s283_s2, 4  ;;  %s146_s23 = int_to_ptr.hbm [resolvable:$true] %s145_s23 }
   0xd   :  { %v79_v2 = vand.u32 2147483647, %v69_v0  ;;  %v80_v3 = vand.u32 2147483647, %v70_v1  ;;  %v71_v12 = vld [vmem:[#allocation5] sm:$0xff]  ;;  %v72_v15 = vld [vmem:[#allocation5 + $0x8] sm:$0xff] }
   0xe   :  { %v73_v17 = vmax.f32 %v69_v0, 0.0  ;;  %v75_v18 = vmul.f32 %v71_v12, %v69_v0  ;;  %v74_v21 = vmax.f32 %v70_v1, 0.0  ;;  %v76_v22 = vmul.f32 %v72_v15, %v70_v1  ;;  %s143_s1 = sshll.u32 %s256_s0, 4  ;;  %s144_s1 = int_to_ptr.vmem [resolvable:$true] %s143_s1 }
   0xf   :  { %v81_v4 = vsub.f32 0.0, %v79_v2  ;;  %v82_v5 = vsub.f32 0.0, %v80_v3 }
  0x10   :  { %v77_v26 = vsub.f32 %v73_v17, %v75_v18  ;;  %v78_v29 = vsub.f32 %v74_v21, %v76_v22 }
  0x11   :  { %v83_v6 = vmul.f32 1.442695, %v81_v4  ;;  %v85_v7 = vmul.f32 1.442695, %v82_v5 }
  0x13   :  { %166 = vpow2.f32 %v83_v6 }
  0x14   :  { %168 = vpow2.f32 %v85_v7 }
  0x19   :  { %v167_v8 = vpop.eup %166 }
  0x1a   :  { %v169_v9 = vpop.eup %168  ;;  %v87_v10 = vadd.f32 1.0, %v167_v8  ;;  %v90_v11 = vmul.f32 -0.5, %v167_v8  ;;  %v93_v19 = vand.u32 2147483647, %v167_v8 }
  0x1b   :  { %v96_v13 = vadd.f32 1.0, %v169_v9  ;;  %v99_v14 = vmul.f32 -0.5, %v169_v9  ;;  %v102_v23 = vand.u32 2147483647, %v169_v9 }
  0x1c   :  { %170 = vlog2.f32 %v87_v10  ;;  %v91_v16 = vadd.f32 1.0, %v90_v11  ;;  %vm94_vm0 = vcmp.lt.f32.partialorder %v93_v19, 0.0004427343 }
  0x1d   :  { %172 = vlog2.f32 %v96_v13  ;;  %v100_v20 = vadd.f32 1.0, %v99_v14  ;;  %vm103_vm1 = vcmp.lt.f32.partialorder %v102_v23, 0.0004427343 }
  0x1e   :  { %v92_v24 = vmul.f32 %v167_v8, %v91_v16 }
  0x1f   :  { %v101_v27 = vmul.f32 %v169_v9, %v100_v20 }
  0x22   :  { %v171_v25 = vpop.eup %170 }
  0x23   :  { %v173_v28 = vpop.eup %172  ;;  %v89_v30 = vmul.f32 0.6931472, %v171_v25 }
  0x24   :  { %v98_v31 = vmul.f32 0.6931472, %v173_v28 }
  0x25   :  { %v95_v32 = vsel %vm94_vm0, %v92_v24, %v89_v30 }
  0x26   :  { %v104_v33 = vsel %vm103_vm1, %v101_v27, %v98_v31  ;;  %v105_v34 = vadd.f32 %v95_v32, %v77_v26 }
  0x27   :  { %v106_v35 = vadd.f32 %v104_v33, %v78_v29 }
  0x29   :  { %v115_v36 = vadd.f32 %v106_v35, %v105_v34 }
  0x2b   :  { %117 = vst [vmem:[#allocation7] sm:$0xff] %v115_v36 }
  0x2c   :  { %148 = dma.vmem_to_hbm [thread:$0]  %s144_s1, 128, %s146_s23, [#allocation4]  }
  0x2d   :  { %250 = dma.done.wait [#allocation4], 128  }
  0x2e   :  { %251 = vsyncadd [#allocation4], 4294967168 }
  0x2f   :  { %153 = vsyncpa [#allocation3], 1 }
  0x30   :  { %154 = vsyncpa [#allocation6], 1 }
  0x31   :  { %155 = vsyncpa [#allocation4], 1 }

</bundles_post_ra>
